<compile_context>
chip_gen: v7x
topology: tpu7x:2x2x1
jax: 0.10.0
libtpu: 0.0.40
codegen_flags: <defaults>
</compile_context>

<pallas_src>
import functools

import jax
import jax.numpy as jnp
from jax.experimental import pallas as pl
from jax.experimental.pallas import tpu as pltpu

LANE = 128        # TPU lane width — hidden dim padded to this
HIDDEN = 50
OUT = 3
OUT_PAD = 8       # output lanes actually stored (3 real classes + 5 padded)
NEG_BIG = -1e30   # bias for padded logit lanes -> exp underflows to exactly 0


def mlp_kernel(x_ref, w1_ref, b1_ref, w2_ref, b2_ref, w3_ref, b3_ref, o_ref):
    # layer 1 + ReLU (padded hidden lanes stay exactly 0: zero W cols, zero bias)
    h1 = jnp.dot(x_ref[...], w1_ref[...], preferred_element_type=jnp.float32)
    h1 = jnp.maximum(h1 + b1_ref[...], 0.0)
    # layer 2 + ReLU
    h2 = jnp.dot(h1, w2_ref[...], preferred_element_type=jnp.float32)
    h2 = jnp.maximum(h2 + b2_ref[...], 0.0)
    # layer 3 + softmax over the 8 stored lanes; padded lanes carry a -1e30 bias
    # so they contribute exp(...) == 0 to the row sum.
    logits = jnp.dot(h2, w3_ref[...], preferred_element_type=jnp.float32)
    logits = logits + b3_ref[...]
    m = jnp.max(logits, axis=-1, keepdims=True)
    e = jnp.exp(logits - m)
    denom = jnp.sum(e, axis=-1, keepdims=True)
    # Exact divide (approx reciprocal was the source of the previous mismatch).
    o_ref[...] = (e / denom).astype(o_ref.dtype)


def _pad2(a, rows, cols, value=0.0):
    return jnp.pad(
        a,
        ((0, rows - a.shape[0]), (0, cols - a.shape[1])),
        constant_values=value,
    )


def pad_params(w1, b1, w2, b2, w3, b3):
    """Pad parameters once (outside the hot path) to MXU/lane-friendly shapes."""
    D = w1.shape[0]
    w1p = _pad2(w1, D, LANE)                      # (D, 128)
    b1p = _pad2(b1, 1, LANE)                      # (1, 128)
    w2p = _pad2(w2, LANE, LANE)                   # (128, 128)
    b2p = _pad2(b2, 1, LANE)                      # (1, 128)
    w3p = _pad2(w3, LANE, OUT_PAD)                # (128, 8)
    b3p = _pad2(b3, 1, OUT_PAD, value=NEG_BIG)    # (1, 8); pads -> softmax weight 0
    return w1p, b1p, w2p, b2p, w3p, b3p


@functools.partial(jax.jit, static_argnames=("block_b",))
def mlp_forward(x, w1p, b1p, w2p, b2p, w3p, b3p, *, block_b=2048):
    B, D = x.shape

    # ---- batch tiling (sublane-aligned; tile capped at 4096 for v7x VMEM)
    b8 = ((B + 7) // 8) * 8
    block_b = max(8, (block_b // 8) * 8)
    tb = min(block_b, b8, 4096)
    # Guarantee >= 2 grid steps when possible so the "parallel" batch axis can
    # shard across v7x's two TensorCores (harmless on v5e/v6e).
    if b8 > 8 and (b8 + tb - 1) // tb < 2:
        tb = max(8, ((b8 // 2 + 7) // 8) * 8)
    n_steps = (b8 + tb - 1) // tb
    b_pad = n_steps * tb
    xp = jnp.pad(x, ((0, b_pad - B), (0, 0)))

    grid = (n_steps,)
    resident = lambda i: (0, 0)  # weights/biases pinned in VMEM across the grid

    flops = 2 * b_pad * (D * LANE + LANE * LANE + LANE * OUT_PAD)
    bytes_accessed = 4 * (
        b_pad * D + w1p.size + b1p.size + w2p.size + b2p.size
        + w3p.size + b3p.size + b_pad * OUT_PAD
    )

    # Only raise the scoped-VMEM limit when the tile is big enough to need it
    # (keeps us well inside v7x's 64 MiB physical VMEM at default tiles).
    vmem_limit = (48 * 1024 * 1024) if tb >= 4096 else None

    out = pl.pallas_call(
        mlp_kernel,
        out_shape=jax.ShapeDtypeStruct((b_pad, OUT_PAD), jnp.float32),
        grid=grid,
        in_specs=[
            pl.BlockSpec((tb, D), lambda i: (i, 0)),      # x: batch-tiled
            pl.BlockSpec((D, LANE), resident),            # w1
            pl.BlockSpec((1, LANE), resident),            # b1
            pl.BlockSpec((LANE, LANE), resident),         # w2
            pl.BlockSpec((1, LANE), resident),            # b2
            pl.BlockSpec((LANE, OUT_PAD), resident),      # w3 (8 output lanes)
            pl.BlockSpec((1, OUT_PAD), resident),         # b3 (pads carry -1e30)
        ],
        out_specs=pl.BlockSpec((tb, OUT_PAD), lambda i: (i, 0)),
        compiler_params=pltpu.CompilerParams(
            dimension_semantics=("parallel",),
            vmem_limit_bytes=vmem_limit),
        cost_estimate=pl.CostEstimate(
            flops=flops,
            transcendentals=b_pad * OUT_PAD,
            bytes_accessed=bytes_accessed),
    )(xp, w1p, b1p, w2p, b2p, w3p, b3p)

    return out[:B, :OUT]


def init_params(key, input_dim):
    # Deterministic synthetic init mimicking nn.Linear's uniform(-1/sqrt(fan_in), +)
    def linear(key, fan_in, fan_out):
        kw, kb = jax.random.split(key)
        bound = 1.0 / jnp.sqrt(fan_in)
        w = jax.random.uniform(kw, (fan_in, fan_out), jnp.float32, -bound, bound)
        b = jax.random.uniform(kb, (1, fan_out), jnp.float32, -bound, bound)
        return w, b

    k1, k2, k3 = jax.random.split(key, 3)
    w1, b1 = linear(k1, input_dim, HIDDEN)
    w2, b2 = linear(k2, HIDDEN, HIDDEN)
    w3, b3 = linear(k3, HIDDEN, OUT)
    return w1, b1, w2, b2, w3, b3


def reference_forward(x, w1, b1, w2, b2, w3, b3):
    h1 = jnp.maximum(x @ w1 + b1, 0.0)
    h2 = jnp.maximum(h1 @ w2 + b2, 0.0)
    logits = h2 @ w3 + b3
    return jax.nn.softmax(logits, axis=1)


if __name__ == "__main__":
    input_dim = 4   # iris features
    batch = 150     # iris-sized; not a multiple of the tile -> exercises padding path

    key = jax.random.PRNGKey(0)
    kx, kp = jax.random.split(key)
    x = jax.random.normal(kx, (batch, input_dim), dtype=jnp.float32)
    params = init_params(kp, input_dim)
    padded = pad_params(*params)   # padded once, outside the jitted forward

    # block_b=64 -> multi-step batch grid even at this small demo size.
    out = jax.block_until_ready(mlp_forward(x, *padded, block_b=64))

    ref = reference_forward(x, *params)
    assert out.shape == (batch, OUT)
    # Tolerance accounts for TPU matmul/exp implementation differences between
    # the Pallas kernel and the XLA reference (both f32 paths).
    assert jnp.allclose(out, ref, atol=2e-3, rtol=2e-3), "mismatch vs reference"
    assert jnp.allclose(jnp.sum(out, axis=1), 1.0, atol=1e-4), "softmax rows must sum to 1"

    print("KERNEL_OK")
</pallas_src>

<mosaic_0001>
module attributes {stable_mosaic.version = 11 : i64} {
  func.func @mlp_kernel(%arg0: i32, %arg1: memref<64x4xf32, #tpu.memory_space<vmem>>, %arg2: memref<4x128xf32, #tpu.memory_space<vmem>>, %arg3: memref<1x128xf32, #tpu.memory_space<vmem>>, %arg4: memref<128x128xf32, #tpu.memory_space<vmem>>, %arg5: memref<1x128xf32, #tpu.memory_space<vmem>>, %arg6: memref<128x8xf32, #tpu.memory_space<vmem>>, %arg7: memref<1x8xf32, #tpu.memory_space<vmem>>, %arg8: memref<64x8xf32, #tpu.memory_space<vmem>>) attributes {dimension_semantics = [#tpu.dimension_semantics<parallel>], iteration_bounds = array<i64: 3>, scalar_prefetch = 0 : i64, scratch_operands = 0 : i64, tpu.core_type = #tpu.core_type<tc>, window_params = [{transform_indices = @transform_0, window_bounds = array<i64: 64, 4>}, {pipeline_mode = #tpu.pipeline_mode<synchronous>, transform_indices = @transform_1, window_bounds = array<i64: 4, 128>}, {pipeline_mode = #tpu.pipeline_mode<synchronous>, transform_indices = @transform_2, window_bounds = array<i64: 1, 128>}, {pipeline_mode = #tpu.pipeline_mode<synchronous>, transform_indices = @transform_3, window_bounds = array<i64: 128, 128>}, {pipeline_mode = #tpu.pipeline_mode<synchronous>, transform_indices = @transform_4, window_bounds = array<i64: 1, 128>}, {pipeline_mode = #tpu.pipeline_mode<synchronous>, transform_indices = @transform_5, window_bounds = array<i64: 128, 8>}, {pipeline_mode = #tpu.pipeline_mode<synchronous>, transform_indices = @transform_6, window_bounds = array<i64: 1, 8>}, {transform_indices = @transform_7, window_bounds = array<i64: 64, 8>}]} {
    %c0 = arith.constant 0 : index
    %c0_0 = arith.constant 0 : index
    %0 = vector.load %arg1[%c0, %c0_0] : memref<64x4xf32, #tpu.memory_space<vmem>>, vector<64x4xf32>
    %c0_1 = arith.constant 0 : index
    %c0_2 = arith.constant 0 : index
    %1 = vector.load %arg2[%c0_1, %c0_2] : memref<4x128xf32, #tpu.memory_space<vmem>>, vector<4x128xf32>
    %cst = arith.constant dense<0.000000e+00> : vector<64x128xf32>
    %2 = tpu.matmul %0, %1, %cst {dimension_numbers = #tpu.dot_dimension_numbers<[1], [0], [0], [1], [0, 0, 1, 1], [], []>} : vector<64x4xf32>, vector<4x128xf32>, vector<64x128xf32> -> vector<64x128xf32>
    %c0_3 = arith.constant 0 : index
    %c0_4 = arith.constant 0 : index
    %3 = vector.load %arg3[%c0_3, %c0_4] : memref<1x128xf32, #tpu.memory_space<vmem>>, vector<1x128xf32>
    %4 = vector.broadcast %3 : vector<1x128xf32> to vector<64x128xf32>
    %5 = arith.addf %2, %4 : vector<64x128xf32>
    %cst_5 = arith.constant 0.000000e+00 : f32
    %6 = vector.broadcast %cst_5 : f32 to vector<64x128xf32>
    %7 = arith.maximumf %5, %6 : vector<64x128xf32>
    %c0_6 = arith.constant 0 : index
    %c0_7 = arith.constant 0 : index
    %8 = vector.load %arg4[%c0_6, %c0_7] : memref<128x128xf32, #tpu.memory_space<vmem>>, vector<128x128xf32>
    %cst_8 = arith.constant dense<0.000000e+00> : vector<64x128xf32>
    %9 = tpu.matmul %7, %8, %cst_8 {dimension_numbers = #tpu.dot_dimension_numbers<[1], [0], [0], [1], [0, 0, 1, 1], [], []>} : vector<64x128xf32>, vector<128x128xf32>, vector<64x128xf32> -> vector<64x128xf32>
    %c0_9 = arith.constant 0 : index
    %c0_10 = arith.constant 0 : index
    %10 = vector.load %arg5[%c0_9, %c0_10] : memref<1x128xf32, #tpu.memory_space<vmem>>, vector<1x128xf32>
    %11 = vector.broadcast %10 : vector<1x128xf32> to vector<64x128xf32>
    %12 = arith.addf %9, %11 : vector<64x128xf32>
    %cst_11 = arith.constant 0.000000e+00 : f32
    %13 = vector.broadcast %cst_11 : f32 to vector<64x128xf32>
    %14 = arith.maximumf %12, %13 : vector<64x128xf32>
    %c0_12 = arith.constant 0 : index
    %c0_13 = arith.constant 0 : index
    %15 = vector.load %arg6[%c0_12, %c0_13] : memref<128x8xf32, #tpu.memory_space<vmem>>, vector<128x8xf32>
    %cst_14 = arith.constant dense<0.000000e+00> : vector<64x8xf32>
    %16 = tpu.matmul %14, %15, %cst_14 {dimension_numbers = #tpu.dot_dimension_numbers<[1], [0], [0], [1], [0, 0, 1, 1], [], []>} : vector<64x128xf32>, vector<128x8xf32>, vector<64x8xf32> -> vector<64x8xf32>
    %c0_15 = arith.constant 0 : index
    %c0_16 = arith.constant 0 : index
    %17 = vector.load %arg7[%c0_15, %c0_16] : memref<1x8xf32, #tpu.memory_space<vmem>>, vector<1x8xf32>
    %18 = vector.broadcast %17 : vector<1x8xf32> to vector<64x8xf32>
    %19 = arith.addf %16, %18 : vector<64x8xf32>
    %cst_17 = arith.constant dense<0xFF800000> : vector<64xf32>
    %20 = vector.multi_reduction <maximumf>, %19, %cst_17 [1] : vector<64x8xf32> to vector<64xf32>
    %21 = vector.shape_cast %20 : vector<64xf32> to vector<64x1xf32>
    %22 = vector.broadcast %21 : vector<64x1xf32> to vector<64x8xf32>
    %23 = arith.subf %19, %22 : vector<64x8xf32>
    %24 = math.exp %23 : vector<64x8xf32>
    %cst_18 = arith.constant dense<0.000000e+00> : vector<64xf32>
    %25 = vector.multi_reduction <add>, %24, %cst_18 [1] : vector<64x8xf32> to vector<64xf32>
    %26 = vector.shape_cast %25 : vector<64xf32> to vector<64x1xf32>
    %27 = vector.broadcast %26 : vector<64x1xf32> to vector<64x8xf32>
    %28 = arith.divf %24, %27 : vector<64x8xf32>
    %c0_19 = arith.constant 0 : index
    %c0_20 = arith.constant 0 : index
    %29 = vector.load %arg8[%c0_19, %c0_20] : memref<64x8xf32, #tpu.memory_space<vmem>>, vector<64x8xf32>
    tpu.vector_store %arg8[%c0_19, %c0_20], %28 {strides = array<i32>} : memref<64x8xf32, #tpu.memory_space<vmem>>, vector<64x8xf32>,
    return
  }
  func.func @transform_0(%arg0: i32) -> (i32, i32) {
    %c0_i32 = arith.constant 0 : i32
    %c0_i32_0 = arith.constant 0 : i32
    return %arg0, %c0_i32 : i32, i32
  }
  func.func @transform_1(%arg0: i32) -> (i32, i32) {
    %c0_i32 = arith.constant 0 : i32
    %c0_i32_0 = arith.constant 0 : i32
    %c0_i32_1 = arith.constant 0 : i32
    return %c0_i32, %c0_i32_0 : i32, i32
  }
  func.func @transform_2(%arg0: i32) -> (i32, i32) {
    %c0_i32 = arith.constant 0 : i32
    %c0_i32_0 = arith.constant 0 : i32
    %c0_i32_1 = arith.constant 0 : i32
    return %c0_i32, %c0_i32_0 : i32, i32
  }
  func.func @transform_3(%arg0: i32) -> (i32, i32) {
    %c0_i32 = arith.constant 0 : i32
    %c0_i32_0 = arith.constant 0 : i32
    %c0_i32_1 = arith.constant 0 : i32
    return %c0_i32, %c0_i32_0 : i32, i32
  }
  func.func @transform_4(%arg0: i32) -> (i32, i32) {
    %c0_i32 = arith.constant 0 : i32
    %c0_i32_0 = arith.constant 0 : i32
    %c0_i32_1 = arith.constant 0 : i32
    return %c0_i32, %c0_i32_0 : i32, i32
  }
  func.func @transform_5(%arg0: i32) -> (i32, i32) {
    %c0_i32 = arith.constant 0 : i32
    %c0_i32_0 = arith.constant 0 : i32
    %c0_i32_1 = arith.constant 0 : i32
    return %c0_i32, %c0_i32_0 : i32, i32
  }
  func.func @transform_6(%arg0: i32) -> (i32, i32) {
    %c0_i32 = arith.constant 0 : i32
    %c0_i32_0 = arith.constant 0 : i32
    %c0_i32_1 = arith.constant 0 : i32
    return %c0_i32, %c0_i32_0 : i32, i32
  }
  func.func @transform_7(%arg0: i32) -> (i32, i32) {
    %c0_i32 = arith.constant 0 : i32
    %c0_i32_0 = arith.constant 0 : i32
    return %arg0, %c0_i32 : i32, i32
  }
}

</mosaic_0001>

<bundles_post_ra>
// kernel: mlp_forward.1
= control target key start
LH: loop header
LB: loop body
LE: loop exit
PB: predicated region body
PF: predicated region fallthrough
CT: control target
= control target key end

     0   :  { %s1191_s24 = smov 0   ;;  %s1365_s0 = inlined_call_operand.vmem [shape: f32[192,4], index: 0, kind: input, shape index: {}]   ;;  %s1366_s1 = inlined_call_operand.vmem [shape: f32[4,128], index: 1, kind: input, shape index: {}]   ;;  %s1367_s2 = inlined_call_operand.vmem [shape: f32[1,128], index: 2, kind: input, shape index: {}]   ;;  %s1368_s3 = inlined_call_operand.vmem [shape: f32[128,128], index: 3, kind: input, shape index: {}]   ;;  %s1369_s4 = inlined_call_operand.vmem [shape: f32[1,128], index: 4, kind: input, shape index: {}]   ;;  %s1370_s5 = inlined_call_operand.vmem [shape: f32[128,8], index: 5, kind: input, shape index: {}]   ;;  %s1371_s6 = inlined_call_operand.vmem [shape: f32[1,8], index: 6, kind: input, shape index: {}]   ;;  %s1372_s7 = inlined_call_operand.vmem [shape: f32[192,8], index: 7, kind: output, shape index: {}]  }
   0x1 LB: > { %s857_s25 = sadd.s32 4294967295, %s1149_s24   ;;  %p861_p0 = scmp.ge.s32.totalorder %s1149_s24, 1  ;;  %s1149_s24 = sphi %s1191_s24, %s17_s24  }
   0x2   : > { %p238_p1 = scmp.lt.s32.totalorder %s1149_s24, 4 }
   0x4   : > { %p239_p2 = pnand %p861_p0, %p238_p1 }
   0x5   : > { %v290_v0 = vld [vmem:[%s1366_s1] sm:$0xf] (!%p239_p2)  ;;  %vm323_vm0 = vcmask (!%p239_p2), 1043456   ;;  %s862_s28 = sshll.u32 (!%p239_p2), %s857_s25, 3  ;;  %v441_v2 = vld [vmem:[%s1368_s3 + $0x8] sm:$0xff] (!%p239_p2)  ;;  %v442_v3 = vld [vmem:[%s1368_s3 + $0x10] sm:$0xff] (!%p239_p2) }
   0x6   : > { %242 = sbr.rel (%p239_p2) target bundleno = 1000 (0x3e8), region = 48  ;;  %v440_v1 = vld [vmem:[%s1368_s3] sm:$0xff] (!%p239_p2)  ;;  %937 = vmatprep.subr.msk.mxu0 (!%p239_p2), %vm323_vm0, %v290_v0  ;;  %p271_p3 = scmp.lt.s32.totalorder (!%p239_p2), %s862_s28, 23  ;;  %v443_v4 = vld [vmem:[%s1368_s3 + $0x18] sm:$0xff] (!%p239_p2)  ;;  %v445_v8 = vld [vmem:[%s1368_s3 + $0x28] sm:$0xff] (!%p239_p2)  ;;  %vm298_vm1 = vcmask (!%p239_p2), 31744  }
   0x7   : > { %938 = vmatpush3.msk.msra.mxu0 (!%p239_p2), %vm323_vm0, %v290_v0  ;;  %v1039_v5 = vpack.c.bf16 (!%p239_p2), %v441_v2, %v440_v1  ;;  %v1043_v6 = vpack.c.bf16 (!%p239_p2), %v443_v4, %v442_v3  ;;  %v444_v7 = vld [vmem:[%s1368_s3 + $0x20] sm:$0xff] (!%p239_p2)  ;;  %v446_v10 = vld [vmem:[%s1368_s3 + $0x30] sm:$0xff] (!%p239_p2)  ;;  %v447_v11 = vld [vmem:[%s1368_s3 + $0x38] sm:$0xff] (!%p239_p2)  ;;  %vm704_vm2 = vcmask (!%p239_p2), 64512  }
   0x8   : > { %v1047_v9 = vpack.c.bf16 (!%p239_p2), %v445_v8, %v444_v7  ;;  %v1051_v16 = vpack.c.bf16 (!%p239_p2), %v447_v11, %v446_v10  ;;  %v448_v18 = vld [vmem:[%s1368_s3 + $0x40] sm:$0xff] (!%p239_p2)  ;;  %v449_v19 = vld [vmem:[%s1368_s3 + $0x48] sm:$0xff] (!%p239_p2)  ;;  %v450_v23 = vld [vmem:[%s1368_s3 + $0x50] sm:$0xff] (!%p239_p2) }
   0x9   : > { %1040 = vmatprep.subr.bf16.mxu1 (!%p239_p2), %v1039_v5  ;;  %v1055_v21 = vpack.c.bf16 (!%p239_p2), %v449_v19, %v448_v18  ;;  %v451_v24 = vld [vmem:[%s1368_s3 + $0x58] sm:$0xff] (!%p239_p2)  ;;  %v452_v27 = vld [vmem:[%s1368_s3 + $0x60] sm:$0xff] (!%p239_p2)  ;;  %v453_v28 = vld [vmem:[%s1368_s3 + $0x68] sm:$0xff] (!%p239_p2) }
   0xa   : > { %1042 = vmatpush3.bf16.msra.mxu1 (!%p239_p2), %v1039_v5  ;;  %v1059_v26 = vpack.c.bf16 (!%p239_p2), %v451_v24, %v450_v23  ;;  %v1063_v29 = vpack.c.bf16 (!%p239_p2), %v453_v28, %v452_v27  ;;  %v454_v30 = vld [vmem:[%s1368_s3 + $0x70] sm:$0xff] (!%p239_p2)  ;;  %v455_v31 = vld [vmem:[%s1368_s3 + $0x78] sm:$0xff] (!%p239_p2)  ;;  %v576_v33 = vld [vmem:[%s1370_s5] sm:$0xff] (!%p239_p2) }
   0xb   : > { %1044 = vmatprep.subr.bf16.mxu1 (!%p239_p2), %v1043_v6  ;;  %v1067_v32 = vpack.c.bf16 (!%p239_p2), %v455_v31, %v454_v30  ;;  %v577_v34 = vld [vmem:[%s1370_s5 + $0x8] sm:$0xff] (!%p239_p2)  ;;  %v578_v35 = vld [vmem:[%s1370_s5 + $0x10] sm:$0xff] (!%p239_p2)  ;;  %v579_v37 = vld [vmem:[%s1370_s5 + $0x18] sm:$0xff] (!%p239_p2) }
   0xc   : > { %v1071_v36 = vpack.c.bf16 (!%p239_p2), %v577_v34, %v576_v33  ;;  %v1075_v38 = vpack.c.bf16 (!%p239_p2), %v579_v37, %v578_v35  ;;  %v580_v39 = vld [vmem:[%s1370_s5 + $0x20] sm:$0xff] (!%p239_p2)  ;;  %v581_v40 = vld [vmem:[%s1370_s5 + $0x28] sm:$0xff] (!%p239_p2)  ;;  %v582_v42 = vld [vmem:[%s1370_s5 + $0x30] sm:$0xff] (!%p239_p2) }
   0xd   : > { %s1374_s28 = smov (!%p271_p3, %s862_s28), 23  ;;  %v1079_v41 = vpack.c.bf16 %v581_v40, %v580_v39  ;;  %v583_v43 = vld [vmem:[%s1370_s5 + $0x38] sm:$0xff]  ;;  %v584_v45 = vld [vmem:[%s1370_s5 + $0x40] sm:$0xff]  ;;  %v585_v46 = vld [vmem:[%s1370_s5 + $0x48] sm:$0xff] }
   0xe   : > { %s863_s18 = sshll.u32 %s1374_s28, 3  ;;  %1046 = vmatpush3.bf16.msra.mxu1 %v1043_v6  ;;  %1072 = vmatprep.subr.bf16.mxu0 %v1071_v36  ;;  %v1083_v44 = vpack.c.bf16 %v583_v43, %v582_v42  ;;  %v1087_v47 = vpack.c.bf16 %v585_v46, %v584_v45  ;;  %v586_v48 = vld [vmem:[%s1370_s5 + $0x50] sm:$0xff]  ;;  %v587_v49 = vld [vmem:[%s1370_s5 + $0x58] sm:$0xff]  ;;  %v588_v51 = vld [vmem:[%s1370_s5 + $0x60] sm:$0xff] }
   0xf   : > { %s274_s21 = scalar_lea.vmem %s1365_s0, %s863_s18  ;;  %1048 = vmatprep.subr.bf16.mxu1 %v1047_v9  ;;  %v1091_v50 = vpack.c.bf16 %v587_v49, %v586_v48  ;;  %v589_v52 = vld [vmem:[%s1370_s5 + $0x68] sm:$0xff]  ;;  %v866_v54 = vld [vmem:[%s1367_s2] ss:$0 sm:$0xff]  ;;  %s1344_s22 = scalar_lea.vmem %s1372_s7, %s863_s18 }
  0x10   : > { %v282_v12 = vld [vmem:[%s274_s21] sm:$0xff]  ;;  %v283_v13 = vld [vmem:[%s274_s21 + $0x8] sm:$0xff]  ;;  %v284_v14 = vld [vmem:[%s274_s21 + $0x10] sm:$0xff]  ;;  %v1095_v53 = vpack.c.bf16 %v589_v52, %v588_v51 }
  0x11   : > { %939 = vmatprep.mubr.msk.f32.mxu0 %vm298_vm1, %v282_v12  ;;  %v285_v15 = vld [vmem:[%s274_s21 + $0x18] sm:$0xff]  ;;  %v286_v17 = vld [vmem:[%s274_s21 + $0x20] sm:$0xff]  ;;  %v287_v20 = vld [vmem:[%s274_s21 + $0x28] sm:$0xff] }
  0x12   : > { %940 = vmatmul.mubr.msk.f32.vlgmr.msra.gmra.mrb[0].mxu0 %vm298_vm1, %v283_v13  ;;  %1050 = vmatpush3.bf16.msra.mxu1 %v1047_v9  ;;  %v288_v22 = vld [vmem:[%s274_s21 + $0x30] sm:$0xff]  ;;  %v289_v25 = vld [vmem:[%s274_s21 + $0x38] sm:$0xff]  ;;  %v876_v18 = vld [vmem:[%s1369_s4] ss:$0 sm:$0xff] }
  0x13   : > { %942 = vmatprep.mubr.msk.f32.mxu0 %vm298_vm1, %v284_v14  ;;  %1052 = vmatprep.subr.bf16.mxu1 %v1051_v16  ;;  %v877_v43 = vld [vmem:[%s1371_s6] ss:$0 sm:$0xff] }
  0x14   : > { %1074 = vmatpush3.bf16.msra.mxu0 %v1071_v36 }
  0x15   : > { %1076 = vmatprep.subr.bf16.mxu0 %v1075_v38 }
  0x16   : > { %943 = vmatmul.mubr.msk.f32.gmra.mrb[2].mxu0 %vm298_vm1, %v285_v15  ;;  %1054 = vmatpush3.bf16.msra.mxu1 %v1051_v16  ;;  %v590_v15 = vld [vmem:[%s1370_s5 + $0x70] sm:$0xff]  ;;  %v591_v16 = vld [vmem:[%s1370_s5 + $0x78] sm:$0xff] }
  0x17   : > { %945 = vmatprep.mubr.msk.f32.mxu0 %vm298_vm1, %v286_v17  ;;  %1056 = vmatprep.subr.bf16.mxu1 %v1055_v21  ;;  %v1099_v17 = vpack.c.bf16 %v591_v16, %v590_v15 }
  0x18   : > { %1078 = vmatpush3.bf16.msra.mxu0 %v1075_v38 }
  0x19   : > { %1080 = vmatprep.subr.bf16.mxu0 %v1079_v41 }
  0x1a   : > { %946 = vmatmul.mubr.msk.f32.gmra.mrb[4].mxu0 %vm298_vm1, %v287_v20  ;;  %1058 = vmatpush3.bf16.msra.mxu1 %v1055_v21 }
  0x1b   : > { %948 = vmatprep.mubr.msk.f32.mxu0 %vm298_vm1, %v288_v22  ;;  %1060 = vmatprep.subr.bf16.mxu1 %v1059_v26 }
  0x1c   : > { %1082 = vmatpush3.bf16.msra.mxu0 %v1079_v41 }
  0x1d   : > { %1084 = vmatprep.subr.bf16.mxu0 %v1083_v44 }
  0x1e   : > { %949 = vmatmul.mubr.msk.f32.gmra.mrb[6].mxu0 %vm298_vm1, %v289_v25  ;;  %1062 = vmatpush3.bf16.msra.mxu1 %v1059_v26 }
  0x1f   : > { %1064 = vmatprep.subr.bf16.mxu1 %v1063_v29 }
  0x20   : > { %1086 = vmatpush3.bf16.msra.mxu0 %v1083_v44 }
  0x21   : > { %1088 = vmatprep.subr.bf16.mxu0 %v1087_v47 }
  0x22   : > { %1066 = vmatpush3.bf16.msra.mxu1 %v1063_v29 }
  0x23   : > { %1068 = vmatprep.subr.bf16.mxu1 %v1067_v32 }
  0x24   : > { %1090 = vmatpush3.bf16.msra.mxu0 %v1087_v47 }
  0x25   : > { %1092 = vmatprep.subr.bf16.mxu0 %v1091_v50 }
  0x26   : > { %1070 = vmatpush3.bf16.msra.mxu1 %v1067_v32 }
  0x28   : > { %1094 = vmatpush3.bf16.msra.mxu0 %v1091_v50 }
  0x29   : > { %1096 = vmatprep.subr.bf16.mxu0 %v1095_v53 }
  0x2c   : > { %1098 = vmatpush3.bf16.msra.mxu0 %v1095_v53 }
  0x2d   : > { %1100 = vmatprep.subr.bf16.mxu0 %v1099_v17 }
  0x30   : > { %1102 = vmatpush3.bf16.msra.mxu0 %v1099_v17 }
  0xe5   : > { %v941_v55 = vpop.f32.mrb[0].mxu0 }
  0xe6   : > { %v399_v56 = vadd.f32 %v941_v55, %v866_v54  ;;  %v393_v57 = vpop.f32.mrb[1].mxu0 }
  0xe7   : > { %v394_v58 = vadd.f32 %v866_v54, %v393_v57 }
  0xe8   : > { %v433_v61 = vmax.f32 %v399_v56, 0.0 }
  0xe9   : > { %v944_v59 = vpop.f32.mrb[2].mxu0  ;;  %v432_v60 = vmax.f32 %v394_v58, 0.0 }
  0xea   : > { %v409_v62 = vadd.f32 %v944_v59, %v866_v54  ;;  %v403_v63 = vpop.f32.mrb[3].mxu0 }
  0xeb   : > { %v404_v0 = vadd.f32 %v866_v54, %v403_v63  ;;  %983 = vmatprep.mubr.f32.mxu1 %v432_v60 }
  0xec   : > { %984 = vmatmul.mubr.f32.vlgmr.msra.gmra.mrb[0].mxu1 %v433_v61  ;;  %v435_v3 = vmax.f32 %v409_v62, 0.0 }
  0xed   : > { %v434_v1 = vmax.f32 %v404_v0, 0.0  ;;  %v947_v2 = vpop.f32.mrb[4].mxu0 }
  0xee   : > { %v419_v4 = vadd.f32 %v947_v2, %v866_v54  ;;  %v413_v5 = vpop.f32.mrb[5].mxu0 }
  0xef   : > { %v414_v6 = vadd.f32 %v866_v54, %v413_v5  ;;  %986 = vmatprep.mubr.f32.mxu1 %v434_v1 }
  0xf0   : > { %v437_v7 = vmax.f32 %v419_v4, 0.0  ;;  %987 = vmatmul.mubr.f32.gmra.mrb[2].mxu1 %v435_v3 }
  0xf1   : > { %v436_v8 = vmax.f32 %v414_v6, 0.0  ;;  %v950_v9 = vpop.f32.mrb[6].mxu0 }
  0xf2   : > { %v429_v10 = vadd.f32 %v950_v9, %v866_v54  ;;  %v423_v11 = vpop.f32.mrb[7].mxu0 }
  0xf3   : > { %v424_v12 = vadd.f32 %v866_v54, %v423_v11  ;;  %989 = vmatprep.mubr.f32.mxu1 %v436_v8 }
  0xf4   : > { %v439_v13 = vmax.f32 %v429_v10, 0.0  ;;  %990 = vmatmul.mubr.f32.gmra.mrb[4].mxu1 %v437_v7 }
  0xf5   : > { %v438_v14 = vmax.f32 %v424_v12, 0.0 }
  0xf7   : > { %992 = vmatprep.mubr.f32.mxu1 %v438_v14 }
  0xf8   : > { %993 = vmatmul.mubr.f32.gmra.mrb[6].mxu1 %v439_v13 }
 0x1bf   : > { %v985_v19 = vpop.f32.mrb[0].mxu1 }
 0x1c0   : > { %v535_v20 = vadd.f32 %v985_v19, %v876_v18  ;;  %v529_v21 = vpop.f32.mrb[1].mxu1 }
 0x1c1   : > { %v530_v22 = vadd.f32 %v876_v18, %v529_v21 }
 0x1c2   : > { %v569_v25 = vmax.f32 %v535_v20, 0.0 }
 0x1c3   : > { %v568_v23 = vmax.f32 %v530_v22, 0.0  ;;  %v988_v24 = vpop.f32.mrb[2].mxu1 }
 0x1c4   : > { %v545_v26 = vadd.f32 %v988_v24, %v876_v18  ;;  %v539_v27 = vpop.f32.mrb[3].mxu1 }
 0x1c5   : > { %v540_v28 = vadd.f32 %v876_v18, %v539_v27  ;;  %1027 = vmatprep.mubr.f32.mxu0 %v568_v23 }
 0x1c6   : > { %1028 = vmatmul.mubr.f32.vlgmr.msra.gmra.mrb[8].mxu0 %v569_v25  ;;  %v571_v31 = vmax.f32 %v545_v26, 0.0 }
 0x1c7   : > { %v570_v29 = vmax.f32 %v540_v28, 0.0  ;;  %v991_v30 = vpop.f32.mrb[4].mxu1 }
 0x1c8   : > { %v555_v32 = vadd.f32 %v991_v30, %v876_v18  ;;  %v549_v33 = vpop.f32.mrb[5].mxu1 }
 0x1c9   : > { %v550_v34 = vadd.f32 %v876_v18, %v549_v33  ;;  %1030 = vmatprep.mubr.f32.mxu0 %v570_v29 }
 0x1ca   : > { %v573_v35 = vmax.f32 %v555_v32, 0.0  ;;  %1031 = vmatmul.mubr.f32.gmra.mrb[10].mxu0 %v571_v31 }
 0x1cb   : > { %v572_v36 = vmax.f32 %v550_v34, 0.0  ;;  %v994_v37 = vpop.f32.mrb[6].mxu1 }
 0x1cc   : > { %v565_v38 = vadd.f32 %v994_v37, %v876_v18  ;;  %v559_v39 = vpop.f32.mrb[7].mxu1 }
 0x1cd   : > { %v560_v40 = vadd.f32 %v876_v18, %v559_v39  ;;  %1033 = vmatprep.mubr.f32.mxu0 %v572_v36 }
 0x1ce   : > { %v575_v41 = vmax.f32 %v565_v38, 0.0  ;;  %1034 = vmatmul.mubr.f32.gmra.mrb[12].mxu0 %v573_v35 }
 0x1cf   : > { %v574_v42 = vmax.f32 %v560_v40, 0.0 }
 0x1d1   : > { %1036 = vmatprep.mubr.f32.mxu0 %v574_v42 }
 0x1d2   : > { %1037 = vmatmul.mubr.f32.gmra.mrb[14].mxu0 %v575_v41 }
 0x299   : > { %v1029_v44 = vpop.f32.mrb[8].mxu0 }
 0x29a   : > { %v671_v45 = vadd.f32 %v1029_v44, %v877_v43  ;;  %v665_v46 = vpop.f32.mrb[9].mxu0 }
 0x29b   : > { %v666_v47 = vadd.f32 %v877_v43, %v665_v46 }
 0x29c   : > { %v708_v48 = vsel %vm704_vm2, %v671_v45, -inf }
 0x29d   : > { %709 = vmax.xlane.f32.xlu0 %v708_v48  ;;  %v1032_v49 = vpop.f32.mrb[10].mxu0  ;;  %v705_v54 = vsel %vm704_vm2, %v666_v47, -inf }
 0x29e   : > { %v681_v50 = vadd.f32 %v1032_v49, %v877_v43  ;;  %v675_v51 = vpop.f32.mrb[11].mxu0 }
 0x29f   : > { %v676_v52 = vadd.f32 %v877_v43, %v675_v51 }
 0x2a0   : > { %v714_v53 = vsel %vm704_vm2, %v681_v50, -inf }
 0x2a1   : > { %715 = vmax.xlane.f32.xlu1 %v714_v53  ;;  %v1035_v55 = vpop.f32.mrb[12].mxu0  ;;  %706 = vmax.xlane.f32.xlu0 %v705_v54  ;;  %v711_v59 = vsel %vm704_vm2, %v676_v52, -inf }
 0x2a2   : > { %v685_v56 = vpop.f32.mrb[13].mxu0  ;;  %v691_v58 = vadd.f32 %v1035_v55, %v877_v43 }
 0x2a3   : > { %v686_v57 = vadd.f32 %v877_v43, %v685_v56 }
 0x2a4   : > { %v720_v1 = vsel %vm704_vm2, %v691_v58, -inf }
 0x2a5   : > { %v1038_v60 = vpop.f32.mrb[14].mxu0  ;;  %712 = vmax.xlane.f32.xlu1 %v711_v59  ;;  %v717_v61 = vsel %vm704_vm2, %v686_v57, -inf }
 0x2a6   : > { %v695_v62 = vpop.f32.mrb[15].mxu0  ;;  %718 = vmax.xlane.f32.xlu0 %v717_v61  ;;  %v701_v0 = vadd.f32 %v1038_v60, %v877_v43 }
 0x2a7   : > { %v696_v63 = vadd.f32 %v877_v43, %v695_v62 }
 0x2a8   : > { %v726_v3 = vsel %vm704_vm2, %v701_v0, -inf }
 0x2a9   : > { %721 = vmax.xlane.f32.xlu1 %v720_v1  ;;  %v723_v2 = vsel %vm704_vm2, %v696_v63, -inf }
 0x2aa   : > { %724 = vmax.xlane.f32.xlu0 %v723_v2 }
 0x2ad   : > { %727 = vmax.xlane.f32.xlu1 %v726_v3 }
 0x32a   : > { %v710_v4 = vpop.xlane.xlu0 %709 }
 0x32b   : > { %v730_v5 = vsub.f32 %v671_v45, %v710_v4 }
 0x32d   : > { %v739_v6 = vmul.f32 1.442695, %v730_v5 }
 0x32e   : > { %v716_v7 = vpop.xlane.xlu1 %715  ;;  %v707_v8 = vpop.xlane.xlu0 %706 }
 0x32f   : > { %1111 = vpow2.f32 %v739_v6  ;;  %v732_v9 = vsub.f32 %v681_v50, %v716_v7  ;;  %v729_v10 = vsub.f32 %v666_v47, %v707_v8 }
 0x331   : > { %v743_v11 = vmul.f32 1.442695, %v732_v9  ;;  %v737_v12 = vmul.f32 1.442695, %v729_v10 }
 0x332   : > { %v713_v13 = vpop.xlane.xlu1 %712 }
 0x333   : > { %1113 = vpow2.f32 %v743_v11  ;;  %v731_v14 = vsub.f32 %v676_v52, %v713_v13  ;;  %v719_v15 = vpop.xlane.xlu0 %718 }
 0x334   : > { %1115 = vpow2.f32 %v737_v12  ;;  %v733_v16 = vsub.f32 %v686_v57, %v719_v15 }
 0x335   : > { %v741_v17 = vmul.f32 1.442695, %v731_v14 }
 0x336   : > { %v745_v18 = vmul.f32 1.442695, %v733_v16  ;;  %v722_v19 = vpop.xlane.xlu1 %721 }
 0x337   : > { %1117 = vpow2.f32 %v741_v17  ;;  %v734_v20 = vsub.f32 %v691_v58, %v722_v19  ;;  %v725_v21 = vpop.xlane.xlu0 %724 }
 0x338   : > { %v735_v22 = vsub.f32 %v696_v63, %v725_v21  ;;  %1119 = vpow2.f32 %v745_v18 }
 0x339   : > { %v1112_v23 = vpop.eup %1111  ;;  %v747_v24 = vmul.f32 1.442695, %v734_v20 }
 0x33a   : > { %v749_v25 = vmul.f32 1.442695, %v735_v22  ;;  %v728_v26 = vpop.xlane.xlu1 %727  ;;  %v756_v27 = vsel %vm704_vm2, %v1112_v23, 0.0 }
 0x33b   : > { %1121 = vpow2.f32 %v747_v24  ;;  %v736_v28 = vsub.f32 %v701_v0, %v728_v26  ;;  %757 = vadd.xlane.f32.xlu1 %v756_v27 }
 0x33c   : > { %1123 = vpow2.f32 %v749_v25 }
 0x33d   : > { %v1114_v29 = vpop.eup %1113  ;;  %v751_v30 = vmul.f32 1.442695, %v736_v28 }
 0x33e   : > { %v1116_v31 = vpop.eup %1115  ;;  %v762_v32 = vsel %vm704_vm2, %v1114_v29, 0.0 }
 0x33f   : > { %1125 = vpow2.f32 %v751_v30  ;;  %763 = vadd.xlane.f32.xlu1 %v762_v32  ;;  %v753_v33 = vsel %vm704_vm2, %v1116_v31, 0.0 }
 0x340   : > { %754 = vadd.xlane.f32.xlu0 %v753_v33 }
 0x341   : > { %v1118_v34 = vpop.eup %1117 }
 0x342   : > { %v759_v35 = vsel %vm704_vm2, %v1118_v34, 0.0  ;;  %v1120_v36 = vpop.eup %1119 }
 0x343   : > { %v765_v39 = vsel %vm704_vm2, %v1120_v36, 0.0 }
 0x344   : > { %760 = vadd.xlane.f32.xlu0 %v759_v35 }
 0x345   : > { %v1122_v37 = vpop.eup %1121 }
 0x346   : > { %v768_v38 = vsel %vm704_vm2, %v1122_v37, 0.0  ;;  %v1124_v40 = vpop.eup %1123 }
 0x347   : > { %769 = vadd.xlane.f32.xlu1 %v768_v38  ;;  %v771_v43 = vsel %vm704_vm2, %v1124_v40, 0.0 }
 0x348   : > { %766 = vadd.xlane.f32.xlu0 %v765_v39 }
 0x349   : > { %v1126_v41 = vpop.eup %1125 }
 0x34a   : > { %v774_v42 = vsel %vm704_vm2, %v1126_v41, 0.0 }
 0x34b   : > { %775 = vadd.xlane.f32.xlu1 %v774_v42 }
 0x34c   : > { %772 = vadd.xlane.f32.xlu0 %v771_v43 }
 0x3c8   : > { %v758_v44 = vpop.xlane.xlu1 %757 }
 0x3c9   : > { %1127 = vrcp.f32 %v758_v44 }
 0x3cc   : > { %v764_v45 = vpop.xlane.xlu1 %763 }
 0x3cd   : > { %1129 = vrcp.f32 %v764_v45  ;;  %v755_v46 = vpop.xlane.xlu0 %754 }
 0x3ce   : > { %1131 = vrcp.f32 %v755_v46 }
 0x3d1   : > { %v761_v47 = vpop.xlane.xlu0 %760 }
 0x3d2   : > { %1133 = vrcp.f32 %v761_v47 }
 0x3d3   : > { %v1128_v48 = vpop.eup %1127 }
 0x3d4   : > { %v780_v49 = vmul.f32 %v1128_v48, %v1112_v23  ;;  %v770_v50 = vpop.xlane.xlu1 %769 }
 0x3d5   : > { %1135 = vrcp.f32 %v770_v50  ;;  %v767_v51 = vpop.xlane.xlu0 %766 }
 0x3d6   : > { %794 = vst.msk [vmem:[%s1344_s22 + $0x8] sm:$0xff] %vm704_vm2, %v780_v49  ;;  %1137 = vrcp.f32 %v767_v51 }
 0x3d7   : > { %v1130_v52 = vpop.eup %1129 }
 0x3d8   : > { %v1132_v53 = vpop.eup %1131  ;;  %v784_v54 = vmul.f32 %v1130_v52, %v1114_v29  ;;  %v776_v55 = vpop.xlane.xlu1 %775 }
 0x3d9   : > { %v778_v56 = vmul.f32 %v1132_v53, %v1116_v31  ;;  %1139 = vrcp.f32 %v776_v55  ;;  %v773_v57 = vpop.xlane.xlu0 %772 }
 0x3da   : > { %796 = vst.msk [vmem:[%s1344_s22 + $0x18] sm:$0xff] %vm704_vm2, %v784_v54  ;;  %1141 = vrcp.f32 %v773_v57 }
 0x3db   : > { %793 = vst.msk [vmem:[%s1344_s22] sm:$0xff] %vm704_vm2, %v778_v56 }
 0x3dc   : > { %v1134_v58 = vpop.eup %1133 }
 0x3dd   : > { %v782_v59 = vmul.f32 %v1134_v58, %v1118_v34 }
 0x3df   : > { %v1136_v60 = vpop.eup %1135  ;;  %795 = vst.msk [vmem:[%s1344_s22 + $0x10] sm:$0xff] %vm704_vm2, %v782_v59 }
 0x3e0   : > { %v1138_v61 = vpop.eup %1137  ;;  %v788_v62 = vmul.f32 %v1136_v60, %v1122_v37 }
 0x3e1   : > { %v786_v63 = vmul.f32 %v1138_v61, %v1120_v36 }
 0x3e2   : > { %798 = vst.msk [vmem:[%s1344_s22 + $0x28] sm:$0xff] %vm704_vm2, %v788_v62 }
 0x3e3   : > { %v1140_v0 = vpop.eup %1139  ;;  %797 = vst.msk [vmem:[%s1344_s22 + $0x20] sm:$0xff] %vm704_vm2, %v786_v63 }
 0x3e4   : > { %v1142_v1 = vpop.eup %1141  ;;  %v792_v2 = vmul.f32 %v1140_v0, %v1126_v41 }
 0x3e5   : > { %v790_v3 = vmul.f32 %v1142_v1, %v1124_v40 }
 0x3e6   : > { %800 = vst.msk [vmem:[%s1344_s22 + $0x38] sm:$0xff] %vm704_vm2, %v792_v2 }
 0x3e7   : > { %799 = vst.msk [vmem:[%s1344_s22 + $0x30] sm:$0xff] %vm704_vm2, %v790_v3 }
 0x3e8 PF: > { %s17_s24 = sadd.s32 1, %s1149_s24  }
 0x3e9   : > { %p14_p4 = scmp.ge.s32.totalorder %s17_s24, 5  }
 0x3eb   :  { %16 = sbr.rel (!%p14_p4) target bundleno = 1 (0x1), region = 78 }

</bundles_post_ra>
